<compile_context>
chip_gen: v7x
topology: tpu7x:2x2x1
jax: 0.10.0
libtpu: 0.0.40
codegen_flags: <defaults>
</compile_context>

<pallas_src>
import functools

import jax
import jax.numpy as jnp
from jax.experimental import pallas as pl
from jax.experimental.pallas import tpu as pltpu


def _round_up(x, m):
    return (x + m - 1) // m * m


def _vmem_limit_bytes():
    """Generation-aware scoped VMEM request: <= half physical, capped at 48 MiB."""
    try:
        cap = pltpu.get_tpu_info().vmem_capacity_bytes
        return int(min(48 * 1024 * 1024, cap // 2))
    except Exception:
        return 32 * 1024 * 1024        # safe on every generation


def _transcendental_dtype():
    """bf16 EUP on v6e/v7x; f32 elsewhere (v5e has no bf16 EUP/VPU)."""
    try:
        kind = jax.devices()[0].device_kind.lower()
    except Exception:
        return jnp.float32
    if ("v6" in kind) or ("v7" in kind) or ("7x" in kind):
        return jnp.bfloat16
    return jnp.float32


def gattconv_kernel(m_ref, h_ref, w1h_ref, w1m_ref, b1_ref, w2_ref,
                    wfh_ref, wfn_ref, bf_ref, o_ref, *, trans_dtype):
    tn, K, D = m_ref.shape

    h = h_ref[...]                              # (tn, D)    bf16 (pre-cast in wrapper)
    m3 = m_ref[...]                             # (tn, K, D) bf16 messages (copy_src mailbox)
    m2 = m3.reshape(tn * K, D)                  # single 2D view for the fc1 matmul

    # --- AttentionAGG._get_attention_weights ------------------------------------
    # fc1 split (w1 = [w1_h; w1_m]): no concat, h-half computed once per node.
    s_h = jnp.dot(h, w1h_ref[...], preferred_element_type=jnp.float32) + b1_ref[...]   # (tn, D)
    s_m = jnp.dot(m2, w1m_ref[...], preferred_element_type=jnp.float32)                # (tn*K, D)

    pre = s_m.reshape(tn, K, D) + s_h[:, None, :]                # (tn, K, D) f32
    s1 = jnp.tanh(pre.astype(trans_dtype))                       # bf16 EUP on v6e/v7x

    # fc2 -> one score per message.  b2 dropped: softmax is shift-invariant.
    score = jnp.sum(s1 * w2_ref[...].reshape(1, 1, D), axis=-1)  # (tn, K) f32
    score = score - jnp.max(score, axis=-1, keepdims=True)
    p = jnp.exp(score.astype(trans_dtype)).astype(jnp.float32)
    denom = jnp.sum(p, axis=-1, keepdims=True)
    att = p * pl.reciprocal(denom, approx=True)                  # (tn, K)

    # neigh = (att_weights * messages).sum over K
    neigh = jnp.sum(att[:, :, None] * m3.astype(jnp.float32), axis=1)   # (tn, D) f32

    # --- rst = ReLU(fc_layer([h_self, neigh])) with split wf = [wf_h; wf_n] ------
    out = (jnp.dot(h, wfh_ref[...], preferred_element_type=jnp.float32)
           + jnp.dot(neigh.astype(jnp.bfloat16), wfn_ref[...],
                     preferred_element_type=jnp.float32)
           + bf_ref[...])                                        # (tn, Fp) lane-dense
    o_ref[...] = jnp.maximum(out, 0.0).astype(o_ref.dtype)


def gattn_forward(feat_src, feat_dst, neigh_idx, params, *, tile_n=512):
    N_dst, D = feat_dst.shape
    N_src = feat_src.shape[0]
    K = neigh_idx.shape[1]
    out_feat = params["wf"].shape[1]

    # Tile selection: clamp to problem size but keep >=2 grid steps (v7x has 2 TensorCores).
    tile_n = _round_up(max(8, min(tile_n, _round_up(N_dst, 8))), 8)
    if N_dst >= 16 and _round_up(N_dst, tile_n) // tile_n < 2:
        tile_n = _round_up(max(8, tile_n // 2), 8)
    Np = _round_up(N_dst, tile_n)
    Fp = _round_up(out_feat, 128)          # lane-dense output slab (unmasked stores)

    # bf16 MXU operands prepared once in the wrapper; biases / accumulation stay f32.
    h = feat_dst.astype(jnp.bfloat16)
    src_bf = feat_src.astype(jnp.bfloat16)
    idx = jnp.clip(neigh_idx.astype(jnp.int32), 0, N_src - 1)
    if Np != N_dst:
        h = jnp.pad(h, ((0, Np - N_dst), (0, 0)))
        idx = jnp.pad(idx, ((0, Np - N_dst), (0, 0)))   # pad rows gather row 0; sliced off

    # copy_src mailbox built by an XLA row gather (clamping, like feat_src[idx] in the ref).
    msgs = src_bf[idx]                                  # (Np, K, D) bf16

    # Split weights (removes both in-kernel concatenations), cast to bf16 for the MXU, and
    # pad the fc_layer to the lane-dense output width.
    w1h = params["w1"][:D].astype(jnp.bfloat16)
    w1m = params["w1"][D:].astype(jnp.bfloat16)
    wfh = jnp.pad(params["wf"][:D], ((0, 0), (0, Fp - out_feat))).astype(jnp.bfloat16)
    wfn = jnp.pad(params["wf"][D:], ((0, 0), (0, Fp - out_feat))).astype(jnp.bfloat16)
    bf = jnp.pad(params["bf"], ((0, 0), (0, Fp - out_feat)))

    kernel = functools.partial(gattconv_kernel, trans_dtype=_transcendental_dtype())
    rep = lambda i: (0, 0)
    out = pl.pallas_call(
        kernel,
        out_shape=jax.ShapeDtypeStruct((Np, Fp), jnp.bfloat16),   # bf16 slab: halve writeback
        grid=(Np // tile_n,),
        in_specs=[
            pl.BlockSpec((tile_n, K, D), lambda i: (i, 0, 0)),    # messages (mailbox)
            pl.BlockSpec((tile_n, D), lambda i: (i, 0)),          # dst features
            pl.BlockSpec((D, D), rep),                            # w1_h
            pl.BlockSpec((D, D), rep),                            # w1_m
            pl.BlockSpec((1, D), rep),                            # b1
            pl.BlockSpec((1, D), rep),                            # w2 (b2 dropped)
            pl.BlockSpec((D, Fp), rep),                           # wf_h (lane-padded)
            pl.BlockSpec((D, Fp), rep),                           # wf_n (lane-padded)
            pl.BlockSpec((1, Fp), rep),                           # bf   (lane-padded)
        ],
        out_specs=pl.BlockSpec((tile_n, Fp), lambda i: (i, 0)),
        compiler_params=pltpu.CompilerParams(
            dimension_semantics=("parallel",),
            vmem_limit_bytes=_vmem_limit_bytes()),
    )(msgs, h, w1h, w1m, params["b1"], params["w2"], wfh, wfn, bf)
    return out[:N_dst, :out_feat].astype(feat_dst.dtype)


def gattn_ref(feat_src, feat_dst, neigh_idx, params):
    """Pure-JAX f32 reference mirroring the PyTorch forward."""
    m = feat_src[neigh_idx]
    h = feat_dst
    att_inp = jnp.concatenate([jnp.broadcast_to(h[:, None, :], m.shape), m], axis=-1)
    s1 = jnp.tanh(att_inp @ params["w1"] + params["b1"])
    score = s1 @ params["w2"].T + params["b2"][0, 0]        # (N, K, 1)
    att = jax.nn.softmax(score, axis=1)
    neigh = jnp.sum(att * m, axis=1)
    out = jnp.concatenate([h, neigh], axis=-1) @ params["wf"] + params["bf"]
    return jnp.maximum(out, 0.0)


def init_params(key, in_feat, out_feat):
    D = in_feat
    k = jax.random.split(key, 6)
    gain_tanh = 5.0 / 3.0
    gain_relu = jnp.sqrt(2.0)

    def xavier(rng, fan_in, fan_out, gain):
        lim = gain * jnp.sqrt(6.0 / (fan_in + fan_out))
        # stored transposed: (fan_in, fan_out) so the kernel computes x @ W
        return jax.random.uniform(rng, (fan_in, fan_out), jnp.float32, -lim, lim)

    def bias(rng, fan_in, n):
        b = 1.0 / jnp.sqrt(fan_in)
        return jax.random.uniform(rng, (1, n), jnp.float32, -b, b)

    return {
        "w1": xavier(k[0], 2 * D, D, gain_tanh),        # AttentionAGG.fc1 (2D -> D)
        "b1": bias(k[1], 2 * D, D),
        "w2": xavier(k[2], D, 1, 1.0).T,                # AttentionAGG.fc2 (D -> 1), stored (1, D)
        "b2": bias(k[3], D, 1),                         # (1, 1) -- used only by the reference
        "wf": xavier(k[4], 2 * D, out_feat, gain_relu), # GAttConv.fc_layer (2D -> out_feat)
        "bf": bias(k[5], 2 * D, out_feat),
    }


if __name__ == "__main__":
    in_feat, out_feat = 32, 16
    N_src, N_dst, K = 32, 16, 8

    root = jax.random.PRNGKey(0)
    kf, ks, kd, ki = jax.random.split(root, 4)
    params = init_params(kf, in_feat, out_feat)
    feat_src = jax.random.normal(ks, (N_src, in_feat), jnp.float32)   # 'u' nodes
    feat_dst = jax.random.normal(kd, (N_dst, in_feat), jnp.float32)   # 'i' nodes (dst of block)
    neigh_idx = jax.random.randint(ki, (N_dst, K), 0, N_src, jnp.int32)

    out = jax.block_until_ready(gattn_forward(feat_src, feat_dst, neigh_idx, params))
    ref = gattn_ref(feat_src, feat_dst, neigh_idx, params)
    assert out.shape == (N_dst, out_feat)
    # bf16 MXU operands / bf16 transcendentals / bf16 output slab -> loose tolerance.
    rel_err = float(jnp.max(jnp.abs(out - ref)) / (jnp.max(jnp.abs(ref)) + 1e-6))
    assert rel_err < 5e-2, f"Pallas kernel mismatch vs JAX reference (rel_err={rel_err})"
    print("KERNEL_OK")
</pallas_src>

<mosaic_0001>
module attributes {stable_mosaic.version = 11 : i64} {
  func.func @gattconv_kernel(%arg0: i32, %arg1: memref<8x8x32xbf16, #tpu.memory_space<vmem>>, %arg2: memref<8x32xbf16, #tpu.memory_space<vmem>>, %arg3: memref<32x32xbf16, #tpu.memory_space<vmem>>, %arg4: memref<32x32xbf16, #tpu.memory_space<vmem>>, %arg5: memref<1x32xf32, #tpu.memory_space<vmem>>, %arg6: memref<1x32xf32, #tpu.memory_space<vmem>>, %arg7: memref<32x128xbf16, #tpu.memory_space<vmem>>, %arg8: memref<32x128xbf16, #tpu.memory_space<vmem>>, %arg9: memref<1x128xf32, #tpu.memory_space<vmem>>, %arg10: memref<8x128xbf16, #tpu.memory_space<vmem>>) attributes {dimension_semantics = [#tpu.dimension_semantics<parallel>], iteration_bounds = array<i64: 2>, scalar_prefetch = 0 : i64, scratch_operands = 0 : i64, tpu.core_type = #tpu.core_type<tc>, window_params = [{transform_indices = @transform_0, window_bounds = array<i64: 8, 8, 32>}, {transform_indices = @transform_1, window_bounds = array<i64: 8, 32>}, {pipeline_mode = #tpu.pipeline_mode<synchronous>, transform_indices = @transform_2, window_bounds = array<i64: 32, 32>}, {pipeline_mode = #tpu.pipeline_mode<synchronous>, transform_indices = @transform_3, window_bounds = array<i64: 32, 32>}, {pipeline_mode = #tpu.pipeline_mode<synchronous>, transform_indices = @transform_4, window_bounds = array<i64: 1, 32>}, {pipeline_mode = #tpu.pipeline_mode<synchronous>, transform_indices = @transform_5, window_bounds = array<i64: 1, 32>}, {pipeline_mode = #tpu.pipeline_mode<synchronous>, transform_indices = @transform_6, window_bounds = array<i64: 32, 128>}, {pipeline_mode = #tpu.pipeline_mode<synchronous>, transform_indices = @transform_7, window_bounds = array<i64: 32, 128>}, {pipeline_mode = #tpu.pipeline_mode<synchronous>, transform_indices = @transform_8, window_bounds = array<i64: 1, 128>}, {transform_indices = @transform_9, window_bounds = array<i64: 8, 128>}]} {
    %c0 = arith.constant 0 : index
    %c0_0 = arith.constant 0 : index
    %0 = vector.load %arg2[%c0, %c0_0] : memref<8x32xbf16, #tpu.memory_space<vmem>>, vector<8x32xbf16>
    %c0_1 = arith.constant 0 : index
    %c0_2 = arith.constant 0 : index
    %c0_3 = arith.constant 0 : index
    %1 = vector.load %arg1[%c0_1, %c0_2, %c0_3] : memref<8x8x32xbf16, #tpu.memory_space<vmem>>, vector<8x8x32xbf16>
    %2 = vector.shape_cast %1 : vector<8x8x32xbf16> to vector<64x32xbf16>
    %c0_4 = arith.constant 0 : index
    %c0_5 = arith.constant 0 : index
    %3 = vector.load %arg3[%c0_4, %c0_5] : memref<32x32xbf16, #tpu.memory_space<vmem>>, vector<32x32xbf16>
    %cst = arith.constant dense<0.000000e+00> : vector<8x32xf32>
    %4 = tpu.matmul %0, %3, %cst {dimension_numbers = #tpu.dot_dimension_numbers<[1], [0], [0], [1], [0, 0, 1, 1], [], []>} : vector<8x32xbf16>, vector<32x32xbf16>, vector<8x32xf32> -> vector<8x32xf32>
    %c0_6 = arith.constant 0 : index
    %c0_7 = arith.constant 0 : index
    %5 = vector.load %arg5[%c0_6, %c0_7] : memref<1x32xf32, #tpu.memory_space<vmem>>, vector<1x32xf32>
    %6 = vector.broadcast %5 : vector<1x32xf32> to vector<8x32xf32>
    %7 = arith.addf %4, %6 : vector<8x32xf32>
    %c0_8 = arith.constant 0 : index
    %c0_9 = arith.constant 0 : index
    %8 = vector.load %arg4[%c0_8, %c0_9] : memref<32x32xbf16, #tpu.memory_space<vmem>>, vector<32x32xbf16>
    %cst_10 = arith.constant dense<0.000000e+00> : vector<64x32xf32>
    %9 = tpu.matmul %2, %8, %cst_10 {dimension_numbers = #tpu.dot_dimension_numbers<[1], [0], [0], [1], [0, 0, 1, 1], [], []>} : vector<64x32xbf16>, vector<32x32xbf16>, vector<64x32xf32> -> vector<64x32xf32>
    %10 = vector.shape_cast %9 : vector<64x32xf32> to vector<8x8x32xf32>
    %11 = vector.shape_cast %7 : vector<8x32xf32> to vector<8x1x32xf32>
    %12 = vector.broadcast %11 : vector<8x1x32xf32> to vector<8x8x32xf32>
    %13 = arith.addf %10, %12 : vector<8x8x32xf32>
    %14 = math.tanh %13 : vector<8x8x32xf32>
    %c0_11 = arith.constant 0 : index
    %c0_12 = arith.constant 0 : index
    %15 = vector.load %arg6[%c0_11, %c0_12] : memref<1x32xf32, #tpu.memory_space<vmem>>, vector<1x32xf32>
    %16 = vector.shape_cast %15 : vector<1x32xf32> to vector<1x1x32xf32>
    %17 = vector.broadcast %16 : vector<1x1x32xf32> to vector<8x8x32xf32>
    %18 = arith.mulf %14, %17 : vector<8x8x32xf32>
    %cst_13 = arith.constant dense<0.000000e+00> : vector<8x8xf32>
    %19 = vector.multi_reduction <add>, %18, %cst_13 [2] : vector<8x8x32xf32> to vector<8x8xf32>
    %cst_14 = arith.constant dense<0xFF800000> : vector<8xf32>
    %20 = vector.multi_reduction <maximumf>, %19, %cst_14 [1] : vector<8x8xf32> to vector<8xf32>
    %21 = vector.shape_cast %20 : vector<8xf32> to vector<8x1xf32>
    %22 = vector.broadcast %21 : vector<8x1xf32> to vector<8x8xf32>
    %23 = arith.subf %19, %22 : vector<8x8xf32>
    %24 = math.exp %23 : vector<8x8xf32>
    %cst_15 = arith.constant dense<0.000000e+00> : vector<8xf32>
    %25 = vector.multi_reduction <add>, %24, %cst_15 [1] : vector<8x8xf32> to vector<8xf32>
    %26 = vector.shape_cast %25 : vector<8xf32> to vector<8x1xf32>
    %27 = tpu.reciprocal %26 {approx = true} : vector<8x1xf32> -> vector<8x1xf32>
    %28 = vector.broadcast %27 : vector<8x1xf32> to vector<8x8xf32>
    %29 = arith.mulf %24, %28 : vector<8x8xf32>
    %30 = vector.shape_cast %29 : vector<8x8xf32> to vector<8x8x1xf32>
    %31 = arith.extf %1 : vector<8x8x32xbf16> to vector<8x8x32xf32>
    %32 = vector.broadcast %30 : vector<8x8x1xf32> to vector<8x8x32xf32>
    %33 = arith.mulf %32, %31 : vector<8x8x32xf32>
    %cst_16 = arith.constant dense<0.000000e+00> : vector<8x32xf32>
    %34 = vector.multi_reduction <add>, %33, %cst_16 [1] : vector<8x8x32xf32> to vector<8x32xf32>
    %c0_17 = arith.constant 0 : index
    %c0_18 = arith.constant 0 : index
    %35 = vector.load %arg7[%c0_17, %c0_18] : memref<32x128xbf16, #tpu.memory_space<vmem>>, vector<32x128xbf16>
    %cst_19 = arith.constant dense<0.000000e+00> : vector<8x128xf32>
    %36 = tpu.matmul %0, %35, %cst_19 {dimension_numbers = #tpu.dot_dimension_numbers<[1], [0], [0], [1], [0, 0, 1, 1], [], []>} : vector<8x32xbf16>, vector<32x128xbf16>, vector<8x128xf32> -> vector<8x128xf32>
    %37 = arith.truncf %34 : vector<8x32xf32> to vector<8x32xbf16>
    %c0_20 = arith.constant 0 : index
    %c0_21 = arith.constant 0 : index
    %38 = vector.load %arg8[%c0_20, %c0_21] : memref<32x128xbf16, #tpu.memory_space<vmem>>, vector<32x128xbf16>
    %cst_22 = arith.constant dense<0.000000e+00> : vector<8x128xf32>
    %39 = tpu.matmul %37, %38, %cst_22 {dimension_numbers = #tpu.dot_dimension_numbers<[1], [0], [0], [1], [0, 0, 1, 1], [], []>} : vector<8x32xbf16>, vector<32x128xbf16>, vector<8x128xf32> -> vector<8x128xf32>
    %40 = arith.addf %36, %39 : vector<8x128xf32>
    %c0_23 = arith.constant 0 : index
    %c0_24 = arith.constant 0 : index
    %41 = vector.load %arg9[%c0_23, %c0_24] : memref<1x128xf32, #tpu.memory_space<vmem>>, vector<1x128xf32>
    %42 = vector.broadcast %41 : vector<1x128xf32> to vector<8x128xf32>
    %43 = arith.addf %40, %42 : vector<8x128xf32>
    %cst_25 = arith.constant 0.000000e+00 : f32
    %44 = vector.broadcast %cst_25 : f32 to vector<8x128xf32>
    %45 = arith.maximumf %43, %44 : vector<8x128xf32>
    %46 = arith.truncf %45 : vector<8x128xf32> to vector<8x128xbf16>
    %c0_26 = arith.constant 0 : index
    %c0_27 = arith.constant 0 : index
    %47 = vector.load %arg10[%c0_26, %c0_27] : memref<8x128xbf16, #tpu.memory_space<vmem>>, vector<8x128xbf16>
    tpu.vector_store %arg10[%c0_26, %c0_27], %46 {strides = array<i32>} : memref<8x128xbf16, #tpu.memory_space<vmem>>, vector<8x128xbf16>,
    return
  }
  func.func @transform_0(%arg0: i32) -> (i32, i32, i32) {
    %c0_i32 = arith.constant 0 : i32
    %c0_i32_0 = arith.constant 0 : i32
    %c0_i32_1 = arith.constant 0 : i32
    return %arg0, %c0_i32, %c0_i32_0 : i32, i32, i32
  }
  func.func @transform_1(%arg0: i32) -> (i32, i32) {
    %c0_i32 = arith.constant 0 : i32
    %c0_i32_0 = arith.constant 0 : i32
    return %arg0, %c0_i32 : i32, i32
  }
  func.func @transform_2(%arg0: i32) -> (i32, i32) {
    %c0_i32 = arith.constant 0 : i32
    %c0_i32_0 = arith.constant 0 : i32
    %c0_i32_1 = arith.constant 0 : i32
    return %c0_i32, %c0_i32_0 : i32, i32
  }
  func.func @transform_3(%arg0: i32) -> (i32, i32) {
    %c0_i32 = arith.constant 0 : i32
    %c0_i32_0 = arith.constant 0 : i32
    %c0_i32_1 = arith.constant 0 : i32
    return %c0_i32, %c0_i32_0 : i32, i32
  }
  func.func @transform_4(%arg0: i32) -> (i32, i32) {
    %c0_i32 = arith.constant 0 : i32
    %c0_i32_0 = arith.constant 0 : i32
    %c0_i32_1 = arith.constant 0 : i32
    return %c0_i32, %c0_i32_0 : i32, i32
  }
  func.func @transform_5(%arg0: i32) -> (i32, i32) {
    %c0_i32 = arith.constant 0 : i32
    %c0_i32_0 = arith.constant 0 : i32
    %c0_i32_1 = arith.constant 0 : i32
    return %c0_i32, %c0_i32_0 : i32, i32
  }
  func.func @transform_6(%arg0: i32) -> (i32, i32) {
    %c0_i32 = arith.constant 0 : i32
    %c0_i32_0 = arith.constant 0 : i32
    %c0_i32_1 = arith.constant 0 : i32
    return %c0_i32, %c0_i32_0 : i32, i32
  }
  func.func @transform_7(%arg0: i32) -> (i32, i32) {
    %c0_i32 = arith.constant 0 : i32
    %c0_i32_0 = arith.constant 0 : i32
    %c0_i32_1 = arith.constant 0 : i32
    return %c0_i32, %c0_i32_0 : i32, i32
  }
  func.func @transform_8(%arg0: i32) -> (i32, i32) {
    %c0_i32 = arith.constant 0 : i32
    %c0_i32_0 = arith.constant 0 : i32
    %c0_i32_1 = arith.constant 0 : i32
    return %c0_i32, %c0_i32_0 : i32, i32
  }
  func.func @transform_9(%arg0: i32) -> (i32, i32) {
    %c0_i32 = arith.constant 0 : i32
    %c0_i32_0 = arith.constant 0 : i32
    return %arg0, %c0_i32 : i32, i32
  }
}

</mosaic_0001>

<bundles_post_ra>
// kernel: tpu_custom_call.1
= control target key start
LH: loop header
LB: loop body
LE: loop exit
PB: predicated region body
PF: predicated region fallthrough
CT: control target
= control target key end

     0   :  { %s2431_s0 = inlined_call_operand.hbm [shape: bf16[16,8,32], index: 0, kind: input, shape index: {}]   ;;  %s2432_s1 = inlined_call_operand.hbm [shape: bf16[16,32], index: 1, kind: input, shape index: {}]   ;;  %s2433_s2 = inlined_call_operand.hbm [shape: bf16[32,32], index: 2, kind: input, shape index: {}]   ;;  %s2434_s3 = inlined_call_operand.hbm [shape: bf16[32,32], index: 3, kind: input, shape index: {}]   ;;  %s2435_s4 = inlined_call_operand.vmem [shape: f32[1,32], index: 4, kind: input, shape index: {}]   ;;  %s2436_s5 = inlined_call_operand.vmem [shape: f32[1,32], index: 5, kind: input, shape index: {}]   ;;  %s2437_s6 = inlined_call_operand.vmem [shape: bf16[32,128], index: 6, kind: input, shape index: {}]   ;;  %s2438_s7 = inlined_call_operand.hbm [shape: bf16[32,128], index: 7, kind: input, shape index: {}]   ;;  %s2439_s8 = inlined_call_operand.vmem [shape: f32[1,128], index: 8, kind: input, shape index: {}]   ;;  %s2440_s9 = inlined_call_operand.hbm [shape: bf16[16,128], index: 9, kind: output, shape index: {}]  }
   0x1   :  { %2449 = sst [smem:[#allocation19_spill]] %s2431_s0 }
   0x2   :  { %2450 = sst [smem:[#allocation20_spill]] %s2433_s2 }
   0x3   :  { %2451 = sst [smem:[#allocation21_spill]] %s2434_s3 }
   0x4   :  { %2452 = sst [smem:[#allocation22_spill]] %s2438_s7 }
   0x5   :  { %2453 = sst [smem:[#allocation23_spill]] %s2440_s9 }
   0x6   :  { %14 = vsyncpa [#allocation3], 0 }
   0x7   :  { %16 = vsyncpa [#allocation3 + $0x1], 0 }
   0x8   :  { %17 = vsyncpa [#allocation6], 0 }
   0x9   :  { %19 = vsyncpa [#allocation6 + $0x1], 0 }
   0xa   :  { %20 = vsyncpa [#allocation9], 0 }
   0xb   :  { %21 = vsyncpa [#allocation4], 0 }
   0xc   :  { %23 = vsyncpa [#allocation4 + $0x1], 0  ;;  %s1945_s30 = smov 0   ;;  %s1947_s10 = smov 0  }
   0xd   :  { %s1949_s11 = smov 0   ;;  %s1951_s12 = smov 0  }
   0xe LB: > { %2454 = sst [smem:[#allocation17_spill]] %s1869_s30  ;;  %s1966_s13 = sadd.s32 4294967295, %s1881_s12   ;;  %s1881_s12 = sphi %s1951_s12, %s2485_s12   ;;  %s1877_s11 = sphi %s1949_s11, %s2484_s11   ;;  %s1873_s10 = sphi %s1947_s10, %s2483_s10   ;;  %s1869_s30 = sphi %s1945_s30, %s2482_s30  }
   0xf   : > { %s1423_s14 = sadd.s32 4294967294, %s1881_s12   ;;  %p49_p0 = scmp.ne.s32.totalorder %s1873_s10, %s1869_s30 }
  0x10   : > { %p2441_p1 = scmp.eq.s32.totalorder %s1966_s13, 0  ;;  %p252_p3 = scmp.eq.s32.totalorder %s1423_s14, 1 }
  0x11   : > { %p1424_p5 = scmp.ge.s32.totalorder %s1881_s12, 1  ;;  %p259_p7 = scmp.lt.s32.totalorder %s1881_s12, 3 }
  0x12   : > { %p1975_p4 = por %p2441_p1, %p49_p0  ;;  %p1980_p6 = por %p252_p3, %p49_p0 }
  0x13   : > { %p1985_p8 = pnand %p1424_p5, %p259_p7  ;;  %s1883_s18 = smov [#allocation7]  }
  0x14   : > { %s2455_s15 = scalar_select %p1975_p4, 1, 0 }
  0x15   : > { %s2456_s16 = scalar_select %p1980_p6, 1, 0 }
  0x16   : > { %s2458_s17 = scalar_select %p1985_p8, 1, 0 }
  0x17   : > { %2457 = sst [smem:[#allocation18_spill]] %s2456_s16  ;;  %s271_s19 = sshll.u32 %s1883_s18, 4  ;;  %s1989_s19 = int_to_ptr.vmem [resolvable:$true] %s271_s19 }
  0x18   : > { %p1537_p9 = pneg %p1985_p8  ;;  %s1884_s21 = smov [#allocation8]  }
  0x19   : > { %s284_s22 = sshll.u32 %s1884_s21, 4  ;;  %s1885_s23 = smov [#allocation10]   ;;  %s2000_s22 = int_to_ptr.vmem [resolvable:$true] %s284_s22 }
  0x1a   : > { %p1996_p11 = pnand %p1537_p9, %p2441_p1  ;;  %s2002_s24 = sshll.u32 %s1885_s23, 4  ;;  %s307_s24 = int_to_ptr.vmem [resolvable:$true] %s2002_s24 }
  0x1b   : > { %s2460_s2 = sld [smem:[#allocation20_spill]] }
  0x1c   : > { %p2012_p13 = pneg %p1996_p11 }
  0x21   : > { %s1659_s27 = scalar_lea.hbm %s2460_s2, 256 }
  0x22   : > { %p1660_p12 = scmp.ne.s32.totalorder %s2460_s2, %s1659_s27  ;;  %p1666_p5 = scmp.lt.u32.totalorder %s1659_s27, %s2460_s2 }
  0x24   : > { %p1662_p0 = pnand %p2012_p13, %p1660_p12 }
  0x26   : > { %p1663_p3 = pneg %p1662_p0 }
  0x28   : > { %p1668_p7 = pnand %p1666_p5, %p1663_p3 }
  0x2a   : > { %1671 = shalt.err (!%p1668_p7)
}
  0x2b   : > { %s1672_s23 = scalar_lea.vmem %s1989_s19, 256  ;;  %p1680_p2 = scmp.lt.s32.totalorder %s1989_s19, %s1989_s19 }
  0x2c   : > { %p1673_p9 = scmp.ne.s32.totalorder %s1989_s19, %s1672_s23  ;;  %p1681_p6 = scmp.lt.s32.totalorder %s1672_s23, %s1672_s23 }
  0x2e   : > { %p1675_p10 = pnand %p1673_p9, %p2012_p13  ;;  %p1682_p12 = por %p1681_p6, %p1680_p2 }
  0x30   : > { %p1676_p1 = pneg %p1675_p10 }
  0x32   : > { %p1683_p0 = pnand %p1682_p12, %p1676_p1 }
  0x34   : > { %1686 = shalt.err (!%p1683_p0)
}
  0x35   : > { %s2447_s25 = smov 64   ;;  %s1887_s26 = smov 4  }
  0x36   : > { %1540 = dma.hbm_to_vmem [thread:$0]  (!%p1996_p11), %s2460_s2, 256, %s1989_s19, [#allocation6], %s2447_s25, %s2447_s25, %s1887_s26  }
  0x37   : > { %s2462_s3 = sld [smem:[#allocation21_spill]] }
  0x3d   : > { %s1687_s21 = scalar_lea.hbm %s2462_s3, 256 }
  0x3e   : > { %p1688_p1 = scmp.ne.s32.totalorder %s2462_s3, %s1687_s21  ;;  %p1694_p10 = scmp.lt.u32.totalorder %s1687_s21, %s2462_s3 }
  0x40   : > { %p1690_p2 = pnand %p1688_p1, %p2012_p13 }
  0x42   : > { %p1691_p6 = pneg %p1690_p2 }
  0x44   : > { %p1696_p3 = pnand %p1694_p10, %p1691_p6 }
  0x46   : > { %1699 = shalt.err (!%p1696_p3)
}
  0x47   : > { %s1700_s19 = scalar_lea.vmem %s2000_s22, 256  ;;  %p1708_p12 = scmp.lt.s32.totalorder %s2000_s22, %s2000_s22 }
  0x48   : > { %p1701_p5 = scmp.ne.s32.totalorder %s2000_s22, %s1700_s19  ;;  %p1709_p0 = scmp.lt.s32.totalorder %s1700_s19, %s1700_s19 }
  0x4a   : > { %p1703_p7 = pnand %p1701_p5, %p2012_p13  ;;  %p1710_p1 = por %p1709_p0, %p1708_p12 }
  0x4c   : > { %p1704_p9 = pneg %p1703_p7 }
  0x4e   : > { %p1711_p2 = pnand %p1710_p1, %p1704_p9 }
  0x50   : > { %1714 = shalt.err (!%p1711_p2)
}
  0x51   : > { %1543 = dma.hbm_to_vmem [thread:$0]  (!%p1996_p11), %s2462_s3, 256, %s2000_s22, [#allocation9], %s2447_s25, %s2447_s25, %s1887_s26  }
  0x52   : > { %s2463_s7 = sld [smem:[#allocation22_spill]] }
  0x58   : > { %s1715_s28 = scalar_lea.hbm %s2463_s7, 256 }
  0x59   : > { %p1716_p6 = scmp.ne.s32.totalorder %s2463_s7, %s1715_s28  ;;  %p1722_p5 = scmp.lt.u32.totalorder %s1715_s28, %s2463_s7 }
  0x5b   : > { %p1718_p10 = pnand %p1716_p6, %p2012_p13 }
  0x5d   : > { %p1719_p3 = pneg %p1718_p10 }
  0x5f   : > { %p1724_p7 = pnand %p1722_p5, %p1719_p3 }
  0x61   : > { %1727 = shalt.err (!%p1724_p7)
}
  0x62   : > { %s1728_s19 = scalar_lea.vmem %s307_s24, 256  ;;  %p1736_p1 = scmp.lt.s32.totalorder %s307_s24, %s307_s24 }
  0x63   : > { %p1729_p9 = scmp.ne.s32.totalorder %s307_s24, %s1728_s19  ;;  %p1737_p2 = scmp.lt.s32.totalorder %s1728_s19, %s1728_s19 }
  0x65   : > { %p1731_p12 = pnand %p1729_p9, %p2012_p13  ;;  %p1738_p4 = por %p1737_p2, %p1736_p1 }
  0x67   : > { %p1732_p0 = pneg %p1731_p12 }
  0x69   : > { %p1739_p8 = pnand %p1738_p4, %p1732_p0 }
  0x6b   : > { %1742 = shalt.err (!%p1739_p8)
}
  0x6c   : > { %1546 = dma.hbm_to_vmem [thread:$0]  (!%p1996_p11), %s2463_s7, 256, %s307_s24, [#allocation9], %s2447_s25, %s2447_s25, %s1887_s26  }
  0x6d   : > { %s2085_s14 = sadd.s32 1, %s1881_s12   ;;  %s36_s30 = sadd.s32 1, %s1877_s11 }
  0x6e   : > { %s33_s20 = ssub.s32 %s1881_s12, %s2085_s14  ;;  %p43_p8 = scmp.ne.s32.totalorder %s1877_s11, %s1873_s10 }
  0x6f   : > { %p34_p4 = scmp.eq.s32.totalorder %s33_s20, 0  ;;  %p44_p13 = scmp.eq.s32.totalorder %s1881_s12, 0 }
  0x70   : > { %p1561_p6 = scmp.lt.s32.totalorder %s1881_s12, 2  ;;  %p2464_p3 = scmp.eq.s32.totalorder %s1966_s13, 1 }
  0x71   : > { %s2095_s16 = scalar_select %p34_p4, %s1877_s11, %s36_s30  }
  0x72   : > { %p45_p10 = por %p44_p13, %p43_p8  ;;  %p2099_p5 = por %p2464_p3, %p43_p8 }
  0x73   : > { %s2104_s28 = sand.u32 1, %s1877_s11   ;;  %s1467_s24 = sshll.u32 %s1881_s12, 9 }
  0x74   : > { %s2465_s27 = scalar_select %p2099_p5, 1, 0 }
  0x75   : > { %s1429_s29 = sshll.u32 %s2104_s28, 5  ;;  %s2466_s0 = sld [smem:[#allocation19_spill]] }
  0x76   : > { %s327_s19 = scalar_lea.vmem [#allocation2], %s1429_s29  ;;  %p2113_p11 = pnand %p1561_p6, %p45_p10 }
  0x77   : > { %s334_s22 = sshll.u32 %s327_s19, 4  ;;  %s324_s30 = scalar_lea.sflag [#allocation3], %s2104_s28  ;;  %s2117_s22 = int_to_ptr.vmem [resolvable:$true] %s334_s22 }
  0x78   : > { %p1745_p9 = pneg %p2113_p11 }
  0x7b   : > { %s2111_s23 = scalar_lea.hbm %s2466_s0, %s1467_s24  ;;  %s1748_s18 = scalar_lea.hbm %s2466_s0, 1024 }
  0x7c   : > { %s1743_s25 = scalar_lea.hbm %s2111_s23, 512  ;;  %p1749_p1 = scmp.lt.u32.totalorder %s2111_s23, %s2466_s0 }
  0x7d   : > { %p1744_p7 = scmp.ne.s32.totalorder %s2111_s23, %s1743_s25  ;;  %p1750_p2 = scmp.lt.u32.totalorder %s1748_s18, %s1743_s25 }
  0x7e   : > { %p1752_p8 = scmp.lt.u32.totalorder %s1743_s25, %s2111_s23 }
  0x7f   : > { %p1746_p12 = pnand %p1745_p9, %p1744_p7  ;;  %p1751_p4 = por %p1750_p2, %p1749_p1 }
  0x81   : > { %p1747_p0 = pneg %p1746_p12  ;;  %p1753_p13 = por %p1752_p8, %p1751_p4 }
  0x83   : > { %p1754_p6 = pnand %p1753_p13, %p1747_p0 }
  0x85   : > { %1757 = shalt.err (!%p1754_p6)
}
  0x86   : > { %s1758_s20 = scalar_lea.vmem %s2117_s22, 512  ;;  %s1888_s24 = smov [#allocation2]  }
  0x87   : > { %p1759_p10 = scmp.ne.s32.totalorder %s2117_s22, %s1758_s20  ;;  %s1763_s29 = sshll.u32 %s1888_s24, 4  ;;  %s1764_s29 = int_to_ptr.vmem [resolvable:$false] %s1763_s29 }
  0x88   : > { %s1765_s21 = scalar_lea.vmem %s1764_s29, 1024  ;;  %p1766_p12 = scmp.lt.s32.totalorder %s2117_s22, %s1764_s29 }
  0x89   : > { %p1761_p3 = pnand %p1759_p10, %p1745_p9  ;;  %p1767_p1 = scmp.lt.s32.totalorder %s1765_s21, %s1758_s20 }
  0x8b   : > { %p1762_p7 = pneg %p1761_p3  ;;  %p1768_p2 = por %p1767_p1, %p1766_p12 }
  0x8d   : > { %p1769_p4 = pnand %p1768_p2, %p1762_p7 }
  0x8f   : > { %1772 = shalt.err (!%p1769_p4)
}
  0x90   : > { %s2468_s25 = smov 64   ;;  %s1432_s18 = sshll.u32 %s2104_s28, 2 }
  0x91   : > { %1550 = dma.hbm_to_vmem [thread:$0]  (!%p2113_p11), %s2111_s23, 512, %s2117_s22, %s324_s30, %s2468_s25, %s2468_s25, %s1887_s26  }
  0x92   : > { %s1433_s19 = sshll.u32 %s1881_s12, 6  ;;  %s348_s21 = scalar_lea.vmem [#allocation5], %s1432_s18 }
  0x93   : > { %s2156_s29 = scalar_lea.hbm %s2432_s1, %s1433_s19  ;;  %s355_s0 = sshll.u32 %s348_s21, 4  ;;  %s356_s0 = int_to_ptr.vmem [resolvable:$true] %s355_s0 }
  0x94   : > { %s2469_s2 = sand.u32 1, %s1881_s12   ;;  %s1773_s7 = scalar_lea.hbm %s2156_s29, 64 }
  0x95   : > { %s345_s3 = scalar_lea.sflag [#allocation6], %s2469_s2  ;;  %p1774_p0 = scmp.ne.s32.totalorder %s2156_s29, %s1773_s7 }
  0x96   : > { %s1778_s23 = scalar_lea.hbm %s2432_s1, 128  ;;  %p1779_p6 = scmp.lt.u32.totalorder %s2156_s29, %s2432_s1 }
  0x97   : > { %p1776_p8 = pnand %p1774_p0, %p1745_p9  ;;  %p1780_p10 = scmp.lt.u32.totalorder %s1778_s23, %s1773_s7 }
  0x98   : > { %p1782_p7 = scmp.lt.u32.totalorder %s1773_s7, %s2156_s29 }
  0x99   : > { %p1777_p13 = pneg %p1776_p8  ;;  %p1781_p3 = por %p1780_p10, %p1779_p6 }
  0x9b   : > { %p1783_p12 = por %p1782_p7, %p1781_p3 }
  0x9d   : > { %p1784_p1 = pnand %p1783_p12, %p1777_p13 }
  0x9f   : > { %1787 = shalt.err (!%p1784_p1)
}
  0xa0   : > { %s1788_s2 = scalar_lea.vmem %s356_s0, 64  ;;  %s1889_s25 = smov [#allocation5]  }
  0xa1   : > { %p1789_p2 = scmp.ne.s32.totalorder %s356_s0, %s1788_s2  ;;  %s1793_s18 = sshll.u32 %s1889_s25, 4  ;;  %s1794_s18 = int_to_ptr.vmem [resolvable:$false] %s1793_s18 }
  0xa2   : > { %s1795_s19 = scalar_lea.vmem %s1794_s18, 128  ;;  %p1796_p8 = scmp.lt.s32.totalorder %s356_s0, %s1794_s18 }
  0xa3   : > { %p1791_p4 = pnand %p1789_p2, %p1745_p9  ;;  %p1797_p5 = scmp.lt.s32.totalorder %s1795_s19, %s1788_s2 }
  0xa5   : > { %p1792_p0 = pneg %p1791_p4  ;;  %p1798_p6 = por %p1797_p5, %p1796_p8 }
  0xa7   : > { %p1799_p10 = pnand %p1798_p6, %p1792_p0 }
  0xa9   : > { %1802 = shalt.err (!%p1799_p10)
}
  0xaa   : > { %1553 = dma.hbm_to_vmem [thread:$0]  (!%p2113_p11), %s2156_s29, 64, %s356_s0, %s345_s3  }
  0xab   : > { %p2470_p13 = scmp.ne.s32.totalorder %s2458_s17, 0 }
  0xac   : > { %s2182_s7 = sand.u32 (!%p2470_p13), 1, %s1873_s10   ;;  %p2471_p5 = scmp.ne.s32.totalorder (!%p2470_p13), %s2455_s15, 0 }
  0xad   : > { %364 = sbr.rel (%p2470_p13) target bundleno = 1488 (0x5d0), region = 56  ;;  %s1435_s20 = sshll.u32 (!%p2470_p13), %s2182_s7, 5 }
  0xae   : > { %s367_s24 = scalar_lea.sflag (!%p2470_p13), [#allocation3], %s2182_s7  ;;  %s2186_s21 = scalar_lea.vmem (!%p2470_p13), [#allocation2], %s1435_s20 }
  0xb4   : > { %1848 = dma.done.wait (%p2471_p5), %s367_s24, 512  }
  0xb5   : > { %1850 = vsyncadd (%p2471_p5), %s367_s24, 4294966784  ;;  %s375_s0 = sand.u32 1, %s1966_s13   ;;  %s1436_s3 = sshll.u32 %s2182_s7, 2 }
  0xb6   : > { %s376_s17 = scalar_lea.sflag [#allocation6], %s375_s0  ;;  %s379_s9 = scalar_lea.vmem [#allocation5], %s1436_s3 }
  0xb7   : > { %1852 = dma.done.wait (%p2471_p5), %s376_s17, 64  }
  0xb8   : > { %1854 = vsyncadd (%p2471_p5), %s376_s17, 4294967232  ;;  %p2472_p11 = scmp.eq.s32.totalorder %s1966_s13, 0 }
  0xba   : > { %1856 = dma.done.wait (%p2472_p11), [#allocation6], 256   ;;  %p2473_p9 = pmov %p2472_p11 }
  0xbc   : > { %1858 = vsyncadd (%p2473_p9), [#allocation6], 4294967040  ;;  %p2474_p3 = pmov %p2473_p9 }
  0xbe   : > { %1860 = dma.done.wait (%p2474_p3), [#allocation9], 512   ;;  %p2475_p7 = pmov %p2474_p3 }
  0xbf   : > { %v1890_v0 = vmov 0.0   ;;  %vm1891_vm0 = vmmov 0   ;;  %v1609_v1 = vld [vmem:[#allocation7] sm:$0xff]   ;;  %v1610_v2 = vld [vmem:[#allocation8] sm:$0xff]   ;;  %v1611_v3 = vld [vmem:[#allocation7 + $0x8] sm:$0xff]   ;;  %vm465_vm1 = vcmask 261120   ;;  %v627_v12 = vlaneseq }
  0xc0   : > { %1862 = vsyncadd (%p2475_p7), [#allocation9], 4294966784  ;;  %1483 = vmatprep.subr.bf16.mxu0 %v1890_v0  ;;  %1487 = vmatprep.mubr.msk.bf16.mxu0 %vm1891_vm0, %v1890_v0  ;;  %v1612_v4 = vld [vmem:[#allocation8 + $0x8] sm:$0xff]   ;;  %v2216_v6 = vld [vmem:[%s2186_s21 + $0x8] sm:$0xff]   ;;  %v1892_v10 = vmov 1966171168  }
  0xc1   : > { %1484 = vmatpush3.bf16.msra.mxu0 %v1609_v1  ;;  %1491 = vmatprep.subr.bf16.mxu1 %v1610_v2  ;;  %v2213_v5 = vld [vmem:[%s2186_s21] sm:$0xff]   ;;  %v2221_v8 = vld [vmem:[%s2186_s21 + $0x10] sm:$0xff]   ;;  %v2235_v9 = vld [vmem:[%s2186_s21 + $0x18] sm:$0xff]   ;;  %v625_v11 = vunpack.c.l.s4 %v1892_v10  ;;  %v2240_v14 = vshrl.u32 %v627_v12, 7  ;;  %vm809_vm2 = vcmask 1041409   ;;  %vm811_vm3 = vcmask 1042434  }
  0xc2   : > { %1485 = vmatprep.subr.bf16.mxu0 %v1890_v0  ;;  %1492 = vmatpush3.bf16.msra.mxu1 %v1610_v2  ;;  %v2218_v7 = vld [vmem:[%s379_s9] sm:$0xf]  ;;  %vm813_vm4 = vcmask 1043459   ;;  %vm815_vm5 = vcmask 1044484   ;;  %vm817_vm6 = vcmask 1045509   ;;  %vm819_vm7 = vcmask 1046534  }
  0xc3   : > { %1493 = vmatprep.subr.bf16.mxu1 %v1612_v4  ;;  %1495 = vmatprep.mubr.msk.bf16.mxu1 %vm465_vm1, %v2213_v5  ;;  %v626_v13 = vunpack.c.0.s8 %v625_v11  ;;  %v1441_v15 = vld [vmem:[%s2435_s4] ss:$0 sm:$0xff]  ;;  %v2247_v25 = vsub.s32 0, %v2240_v14  ;;  %vm821_vm8 = vcmask 1047559   ;;  %vm824_vm9 = vcmask 64512   ;;  %s1464_s19 = sshll.u32 %s1966_s13, 6 }
  0xc4   : > { %v1455_v60 = vld [vmem:[%s2436_s5] ss:$0 sm:$0xff]  ;;  %s430_s20 = scalar_lea.vmem [#allocation11], %s1436_s3  ;;  %s2476_s17 = sld [smem:[#allocation23_spill]] }
  0xc5   : > { %1486 = vmatpush3.bf16.msra.mxu0 %v1611_v3  ;;  %v629_v16 = vsub.s32 %v626_v13, %v2240_v14  ;;  %s1302_s24 = sshll.u32 %s430_s20, 4  ;;  %s1289_s15 = scalar_lea.sflag [#allocation4], %s2182_s7  ;;  %s2389_s24 = int_to_ptr.vmem [resolvable:$true] %s1302_s24 }
  0xc6   : > { %1503 = vmatprep.subr.bf16.mxu0 %v1890_v0  ;;  %1494 = vmatpush3.bf16.msra.mxu1 %v1612_v4  ;;  %s1803_s29 = scalar_lea.vmem %s2389_s24, 64  ;;  %p2477_p1 = scmp.ne.s32.totalorder %s2465_s27, 0 }
  0xc7   : > { %p1804_p12 = scmp.ne.s32.totalorder %s2389_s24, %s1803_s29  ;;  %s1894_s13 = smov [#allocation11]  }
  0xc8   : > { %1488 = vmatmul.mubr.msk.bf16.vlgmr.msra.gmra.mrb[0].mxu0 %vm465_vm1, %v2218_v7  ;;  %s1807_s3 = sshll.u32 %s1894_s13, 4  ;;  %s1808_s3 = int_to_ptr.vmem [resolvable:$false] %s1807_s3 }
  0xc9   : > { %1507 = vmatprep.mubr.msk.bf16.mxu0 %vm1891_vm0, %v1890_v0  ;;  %1496 = vmatmul.mubr.msk.bf16.vlgmr.msra.gmra.mrb[0].mxu1 %vm465_vm1, %v2216_v6  ;;  %p1805_p2 = pnand %p1804_p12, %p2477_p1  ;;  %s1809_s26 = scalar_lea.vmem %s1808_s3, 128 }
  0xca   : > { %1499 = vmatprep.mubr.msk.bf16.mxu1 %vm465_vm1, %v2221_v8  ;;  %s2387_s9 = scalar_lea.hbm %s2476_s17, %s1464_s19  ;;  %p1810_p0 = scmp.lt.s32.totalorder %s2389_s24, %s1808_s3 }
  0xcb   : > { %p1806_p4 = pneg %p1805_p2  ;;  %p1811_p8 = scmp.lt.s32.totalorder %s1809_s26, %s1803_s29 }
  0xcd   : > { %p1812_p6 = por %p1811_p8, %p1810_p0 }
  0xcf   : > { %p1813_p10 = pnand %p1812_p6, %p1806_p4 }
  0xd1   : > { %1500 = vmatmul.mubr.msk.bf16.gmra.mrb[4].mxu1 %vm465_vm1, %v2235_v9 }
 0x19b   : > { %v503_v17 = vpop.f32.mrb[0].mxu0 }
 0x19c   : > { %v504_v18 = vadd.f32 %v1441_v15, %v503_v17  ;;  %v1489_v19 = vpop.f32.mrb[1].mxu0  ;;  %v1497_v21 = vpop.f32.mrb[0].mxu1 }
 0x19d   : > { %v506_v20 = vpop.f32.mrb[2].mxu0  ;;  %v591_v26 = vpop.f32.mrb[1].mxu1 }
 0x19e   : > { %v623_v22 = vcombine.high %v504_v18, %v504_v18  ;;  %v630_v23 = vrot.slane %v504_v18, %v629_v16  ;;  %v1490_v24 = vpop.f32.mrb[3].mxu0  ;;  %v1498_v27 = vpop.f32.mrb[2].mxu1 }
 0x19f   : > { %v594_v31 = vpop.f32.mrb[3].mxu1 }
 0x1a0   : > { %v637_v28 = vrot.slane %v623_v22, %v629_v16  ;;  %v638_v29 = vcombine.high %v630_v23, %v630_v23  ;;  %v646_v30 = vrot.slane %v630_v23, %v629_v16 }
 0x1a2   : > { %v639_v32 = vcombine.high %v637_v28, %v637_v28  ;;  %v668_v33 = vcombine.high %v646_v30, %v646_v30  ;;  %v675_v34 = vrot.slane %v646_v30, %v2247_v25  ;;  %v660_v35 = vrot.slane %v638_v29, %v629_v16 }
 0x1a3   : > { %v653_v36 = vrot.slane %v637_v28, %v629_v16  ;;  %v776_v30 = vand.u32 127, %v627_v12 }
 0x1a4   : > { %v683_v37 = vrot.slane %v668_v33, %v2247_v25  ;;  %v712_v38 = vadd.f32 %v675_v34, %v591_v26  ;;  %v670_v39 = vcombine.high %v660_v35, %v660_v35  ;;  %v679_v40 = vrot.slane %v660_v35, %v2247_v25  ;;  %v1501_v41 = vpop.f32.mrb[4].mxu1 }
 0x1a5   : > { %v669_v42 = vcombine.high %v653_v36, %v653_v36  ;;  %v691_v43 = vrot.slane %v653_v36, %v2247_v25  ;;  %v667_v44 = vrot.slane %v639_v32, %v629_v16  ;;  %v607_v48 = vpop.f32.mrb[5].mxu1  ;;  %v2270_v32 = vsub.s32 %v776_v30, %v2240_v14 }
 0x1a6   : > { %v714_v45 = vadd.f32 %v1497_v21, %v683_v37  ;;  %1625 = vtanh.f32 %v712_v38  ;;  %v687_v46 = vrot.slane %v670_v39, %v2247_v25  ;;  %v713_v47 = vadd.f32 %v679_v40, %v594_v31  ;;  %v1502_v51 = vpop.f32.mrb[6].mxu1 }
 0x1a7   : > { %v699_v49 = vrot.slane %v669_v42, %v2247_v25  ;;  %v716_v50 = vadd.f32 %v691_v43, %v607_v48  ;;  %v671_v52 = vcombine.high %v667_v44, %v667_v44  ;;  %v695_v53 = vrot.slane %v667_v44, %v2247_v25  ;;  %v610_v55 = vpop.f32.mrb[7].mxu1 }
 0x1a8   : > { %1627 = vtanh.f32 %v714_v45  ;;  %v715_v54 = vadd.f32 %v1498_v27, %v687_v46 }
 0x1a9   : > { %1629 = vtanh.f32 %v713_v47  ;;  %v718_v56 = vadd.f32 %v1501_v41, %v699_v49  ;;  %v703_v57 = vrot.slane %v671_v52, %v2247_v25  ;;  %v717_v58 = vadd.f32 %v695_v53, %v610_v55 }
 0x1aa   : > { %1631 = vtanh.f32 %v715_v54  ;;  %v1893_v55 = vmov 0  }
 0x1ab   : > { %v719_v59 = vadd.f32 %v1502_v51, %v703_v57  ;;  %1633 = vtanh.f32 %v716_v50  ;;  %1608 = vset.pattern.permute.xlu0 %v1893_v55  ;;  %1607 = vset.pattern.permute.xlu1 %v1893_v55  ;;  %v839_v57 = vsub.s32 2, %v2240_v14 }
 0x1ac   : > { %1635 = vtanh.f32 %v718_v56  ;;  %v835_v56 = vsub.s32 1, %v2240_v14 }
 0x1ad   : > { %1637 = vtanh.f32 %v717_v58  ;;  %v843_v58 = vsub.s32 3, %v2240_v14 }
 0x1ae   : > { %1639 = vtanh.f32 %v719_v59 }
 0x1b0   : > { %v1626_v61 = vpop.eup %1625 }
 0x1b1   : > { %v735_v62 = vmul.f32 %v1626_v61, %v1455_v60 }
 0x1b2   : > { %v1628_v63 = vpop.eup %1627 }
 0x1b3   : > { %v1630_v1 = vpop.eup %1629  ;;  %v743_v2 = vsel %vm465_vm1, %v735_v62, 0.0  ;;  %v737_v3 = vmul.f32 %v1628_v63, %v1455_v60  ;;  %v847_v63 = vsub.s32 4, %v2240_v14 }
 0x1b4   : > { %v1632_v4 = vpop.eup %1631  ;;  %744 = vadd.xlane.f32.xlu0 %v743_v2  ;;  %v736_v10 = vmul.f32 %v1630_v1, %v1455_v60 }
 0x1b5   : > { %v749_v11 = vsel %vm465_vm1, %v737_v3, 0.0  ;;  %v738_v13 = vmul.f32 %v1632_v4, %v1455_v60  ;;  %v1634_v15 = vpop.eup %1633 }
 0x1b6   : > { %750 = vadd.xlane.f32.xlu1 %v749_v11  ;;  %v1636_v16 = vpop.eup %1635  ;;  %v746_v17 = vsel %vm465_vm1, %v736_v10, 0.0  ;;  %v739_v18 = vmul.f32 %v1634_v15, %v1455_v60 }
 0x1b7   : > { %v1638_v19 = vpop.eup %1637  ;;  %v752_v20 = vsel %vm465_vm1, %v738_v13, 0.0  ;;  %v741_v24 = vmul.f32 %v1636_v16, %v1455_v60  ;;  %v851_v13 = vsub.s32 5, %v2240_v14 }
 0x1b8   : > { %747 = vadd.xlane.f32.xlu0 %v746_v17  ;;  %v740_v21 = vmul.f32 %v1638_v19, %v1455_v60  ;;  %v1640_v22 = vpop.eup %1639  ;;  %v755_v23 = vsel %vm465_vm1, %v739_v18, 0.0  ;;  %v855_v18 = vsub.s32 6, %v2240_v14 }
 0x1b9   : > { %v742_v27 = vmul.f32 %v1640_v22, %v1455_v60  ;;  %v761_v28 = vsel %vm465_vm1, %v741_v24, 0.0  ;;  %v859_v22 = vsub.s32 7, %v2240_v14 }
 0x1ba   : > { %753 = vadd.xlane.f32.xlu1 %v752_v20  ;;  %v758_v26 = vsel %vm465_vm1, %v740_v21, 0.0 }
 0x1bb   : > { %v764_v29 = vsel %vm465_vm1, %v742_v27, 0.0 }
 0x1bc   : > { %756 = vadd.xlane.f32.xlu0 %v755_v23 }
 0x1be   : > { %759 = vadd.xlane.f32.xlu1 %v758_v26 }
 0x1c0   : > { %762 = vadd.xlane.f32.xlu0 %v761_v28 }
 0x1c2   : > { %765 = vadd.xlane.f32.xlu1 %v764_v29 }
 0x241   : > { %v745_v31 = vpop.xlane.xlu0 %744 }
 0x242   : > { %v780_v35 = vrot.slane %v745_v31, %v2270_v32 }
 0x243   : > { %v751_v33 = vpop.xlane.xlu1 %750 }
 0x244   : > { %v788_v37 = vrot.slane %v751_v33, %v2270_v32 }
 0x245   : > { %v748_v34 = vpop.xlane.xlu0 %747 }
 0x246   : > { %v784_v36 = vrot.slane %v748_v34, %v2270_v32 }
 0x247   : > { %v754_v38 = vpop.xlane.xlu1 %753 }
 0x248   : > { %v810_v39 = vsel %vm809_vm2, %v784_v36, %v780_v35  ;;  %v792_v12 = vrot.slane %v754_v38, %v2270_v32 }
 0x249   : > { %v812_v40 = vsel %vm811_vm3, %v788_v37, %v810_v39  ;;  %v757_v41 = vpop.xlane.xlu0 %756 }
 0x24a   : > { %v814_v42 = vsel %vm813_vm4, %v792_v12, %v812_v40  ;;  %v796_v43 = vrot.slane %v757_v41, %v2270_v32 }
 0x24b   : > { %v760_v44 = vpop.xlane.xlu1 %759 }
 0x24c   : > { %v816_v45 = vsel %vm815_vm5, %v796_v43, %v814_v42  ;;  %v800_v46 = vrot.slane %v760_v44, %v2270_v32 }
 0x24d   : > { %v763_v47 = vpop.xlane.xlu0 %762 }
 0x24e   : > { %v804_v48 = vrot.slane %v763_v47, %v2270_v32  ;;  %v818_v49 = vsel %vm817_vm6, %v800_v46, %v816_v45 }
 0x24f   : > { %v766_v50 = vpop.xlane.xlu1 %765 }
 0x250   : > { %v808_v51 = vrot.slane %v766_v50, %v2270_v32  ;;  %v820_v52 = vsel %vm819_vm7, %v804_v48, %v818_v49 }
 0x252   : > { %v822_v53 = vsel %vm821_vm8, %v808_v51, %v820_v52 }
 0x253   : > { %v825_v54 = vsel %vm824_vm9, %v822_v53, -inf }
 0x254   : > { %826 = vmax.xlane.f32.xlu0 %v825_v54 }
 0x2e1   : > { %v827_v59 = vpop.xlane.xlu0 %826 }
 0x2e2   : > { %v832_v60 = vrot.slane %v827_v59, %v2247_v25  ;;  %v836_v61 = vrot.slane %v827_v59, %v835_v56  ;;  %v840_v62 = vrot.slane %v827_v59, %v839_v57  ;;  %v844_v1 = vrot.slane %v827_v59, %v843_v58 }
 0x2e3   : > { %v848_v15 = vrot.slane %v827_v59, %v847_v63  ;;  %v852_v19 = vrot.slane %v827_v59, %v851_v13  ;;  %v856_v23 = vrot.slane %v827_v59, %v855_v18  ;;  %v860_v29 = vrot.slane %v827_v59, %v859_v22 }
 0x2e4   : > { %v869_v2 = vsub.f32 %v745_v31, %v832_v60  ;;  %v870_v3 = vsub.f32 %v748_v34, %v836_v61  ;;  %v871_v4 = vsub.f32 %v751_v33, %v840_v62  ;;  %v872_v16 = vsub.f32 %v754_v38, %v844_v1 }
 0x2e5   : > { %v873_v20 = vsub.f32 %v757_v41, %v848_v15  ;;  %v874_v24 = vsub.f32 %v760_v44, %v852_v19  ;;  %v875_v30 = vsub.f32 %v763_v47, %v856_v23  ;;  %v876_v34 = vsub.f32 %v766_v50, %v860_v29 }
 0x2e6   : > { %v877_v10 = vmul.f32 1.442695, %v869_v2  ;;  %v879_v11 = vmul.f32 1.442695, %v870_v3  ;;  %v881_v17 = vmul.f32 1.442695, %v871_v4 }
 0x2e7   : > { %v883_v21 = vmul.f32 1.442695, %v872_v16  ;;  %v885_v26 = vmul.f32 1.442695, %v873_v20  ;;  %v887_v31 = vmul.f32 1.442695, %v874_v24 }
 0x2e8   : > { %1641 = vpow2.f32 %v877_v10  ;;  %v889_v35 = vmul.f32 1.442695, %v875_v30  ;;  %v891_v37 = vmul.f32 1.442695, %v876_v34  ;;  %v1617_v30 = vld [vmem:[#allocation10] sm:$0xff]  }
 0x2e9   : > { %1643 = vpow2.f32 %v879_v11  ;;  %1504 = vmatpush3.bf16.msra.mxu0 %v1617_v30 }
 0x2ea   : > { %1645 = vpow2.f32 %v881_v17  ;;  %1505 = vmatprep.subr.bf16.mxu0 %v1890_v0 }
 0x2eb   : > { %1647 = vpow2.f32 %v883_v21 }
 0x2ec   : > { %1649 = vpow2.f32 %v885_v26 }
 0x2ed   : > { %1651 = vpow2.f32 %v887_v31  ;;  %v1018_v31 = vunpack.c.l.bf16 %v2213_v5 }
 0x2ee   : > { %1653 = vpow2.f32 %v889_v35 }
 0x2ef   : > { %1655 = vpow2.f32 %v891_v37 }
 0x2f2   : > { %v1642_v27 = vpop.eup %1641 }
 0x2f3   : > { %v1644_v28 = vpop.eup %1643  ;;  %902 = vperm.xlu1 %1607, %v1642_v27  }
 0x2f4   : > { %905 = vperm.xlu0 %1608, %v1644_v28   ;;  %v1646_v33 = vpop.eup %1645 }
 0x2f5   : > { %v1648_v36 = vpop.eup %1647 }
 0x2f6   : > { %v1650_v38 = vpop.eup %1649 }
 0x2f7   : > { %908 = vperm.xlu1 %1607, %v1646_v33   ;;  %v1652_v39 = vpop.eup %1651 }
 0x2f8   : > { %v1654_v12 = vpop.eup %1653 }
 0x2f9   : > { %v1656_v40 = vpop.eup %1655 }
 0x2fb   : > { %911 = vperm.xlu1 %1607, %v1648_v36  }
 0x2ff   : > { %914 = vperm.xlu1 %1607, %v1650_v38  }
 0x303   : > { %917 = vperm.xlu1 %1607, %v1652_v39  }
 0x307   : > { %920 = vperm.xlu1 %1607, %v1654_v12  }
 0x30b   : > { %923 = vperm.xlu1 %1607, %v1656_v40  }
 0x372   : > { %v903_v41 = vpop.permute.xlu1 %902 }
 0x373   : > { %v906_v45 = vpop.permute.xlu0 %905  ;;  %v928_v48 = vrot.slane %v903_v41, %v2270_v32 }
 0x374   : > { %v932_v47 = vrot.slane %v906_v45, %v2270_v32 }
 0x376   : > { %v909_v42 = vpop.permute.xlu1 %908  ;;  %v957_v53 = vsel %vm809_vm2, %v932_v47, %v928_v48 }
 0x377   : > { %v936_v49 = vrot.slane %v909_v42, %v2270_v32 }
 0x379   : > { %v958_v55 = vsel %vm811_vm3, %v936_v49, %v957_v53 }
 0x37a   : > { %v912_v43 = vpop.permute.xlu1 %911 }
 0x37b   : > { %v940_v50 = vrot.slane %v912_v43, %v2270_v32 }
 0x37d   : > { %v959_v60 = vsel %vm813_vm4, %v940_v50, %v958_v55 }
 0x37e   : > { %v915_v44 = vpop.permute.xlu1 %914 }
 0x37f   : > { %v944_v51 = vrot.slane %v915_v44, %v2270_v32  ;;  %v1022_v44 = vunpack.c.l.bf16 %v2221_v8 }
 0x381   : > { %v960_v61 = vsel %vm815_vm5, %v944_v51, %v959_v60 }
 0x382   : > { %v918_v46 = vpop.permute.xlu1 %917 }
 0x383   : > { %v948_v54 = vrot.slane %v918_v46, %v2270_v32 }
 0x385   : > { %v961_v1 = vsel %vm817_vm6, %v948_v54, %v960_v61 }
 0x386   : > { %v921_v52 = vpop.permute.xlu1 %920 }
 0x387   : > { %v952_v59 = vrot.slane %v921_v52, %v2270_v32  ;;  %v1023_v52 = vunpack.c.h.bf16 %v2221_v8 }
 0x389   : > { %v962_v3 = vsel %vm819_vm7, %v952_v59, %v961_v1 }
 0x38a   : > { %v924_v62 = vpop.permute.xlu1 %923 }
 0x38b   : > { %v956_v2 = vrot.slane %v924_v62, %v2270_v32 }
 0x38d   : > { %v963_v4 = vsel %vm821_vm8, %v956_v2, %v962_v3  ;;  %v1024_v2 = vunpack.c.l.bf16 %v2235_v9 }
 0x38e   : > { %v965_v10 = vsel %vm824_vm9, %v963_v4, 0.0 }
 0x38f   : > { %966 = vadd.xlane.f32.xlu1 %v965_v10 }
 0x41c   : > { %v967_v11 = vpop.xlane.xlu1 %966 }
 0x41d   : > { %1657 = vrcp.f32 %v967_v11 }
 0x427   : > { %v1658_v15 = vpop.eup %1657 }
 0x428   : > { %v973_v16 = vrot.slane %v1658_v15, %v2247_v25  ;;  %v977_v19 = vrot.slane %v1658_v15, %v835_v56  ;;  %v981_v32 = vrot.slane %v1658_v15, %v839_v57  ;;  %v985_v23 = vrot.slane %v1658_v15, %v843_v58 }
 0x429   : > { %v989_v26 = vrot.slane %v1658_v15, %v847_v63  ;;  %v993_v56 = vrot.slane %v1658_v15, %v851_v13  ;;  %v997_v57 = vrot.slane %v1658_v15, %v855_v18  ;;  %v1001_v58 = vrot.slane %v1658_v15, %v859_v22  ;;  %v1618_v63 = vld [vmem:[#allocation10 + $0x8] sm:$0xff]  }
 0x42a   : > { %v1010_v17 = vmul.f32 %v1642_v27, %v973_v16  ;;  %v1011_v20 = vmul.f32 %v1644_v28, %v977_v19  ;;  %v1012_v21 = vmul.f32 %v1646_v33, %v981_v32  ;;  %v1013_v24 = vmul.f32 %v1648_v36, %v985_v23  ;;  %1506 = vmatpush3.bf16.msra.mxu0 %v1618_v63 }
 0x42b   : > { %v1014_v25 = vmul.f32 %v1650_v38, %v989_v26  ;;  %v1015_v27 = vmul.f32 %v1652_v39, %v993_v56  ;;  %v1016_v28 = vmul.f32 %v1654_v12, %v997_v57  ;;  %v1017_v29 = vmul.f32 %v1656_v40, %v1001_v58  ;;  %1511 = vmatprep.subr.bf16.mxu0 %v1890_v0 }
 0x42c   : > { %1028 = vperm.xlu0 %1608, %v1010_v17   ;;  %v1019_v18 = vunpack.c.h.bf16 %v2213_v5  ;;  %v1020_v22 = vunpack.c.l.bf16 %v2216_v6  ;;  %v1021_v39 = vunpack.c.h.bf16 %v2216_v6  ;;  %v1025_v32 = vunpack.c.h.bf16 %v2235_v9 }
 0x430   : > { %1033 = vperm.xlu0 %1608, %v1011_v20  }
 0x434   : > { %1038 = vperm.xlu0 %1608, %v1012_v21  }
 0x438   : > { %1043 = vperm.xlu0 %1608, %v1013_v24  }
 0x43c   : > { %1048 = vperm.xlu0 %1608, %v1014_v25  }
 0x440   : > { %1053 = vperm.xlu0 %1608, %v1015_v27  }
 0x444   : > { %1058 = vperm.xlu0 %1608, %v1016_v28  }
 0x448   : > { %1063 = vperm.xlu0 %1608, %v1017_v29  }
 0x4ab   : > { %v1029_v13 = vpop.permute.xlu0 %1028 }
 0x4ac   : > { %v1066_v34 = vmul.f32 %v1029_v13, %v1018_v31 }
 0x4ae   : > { %v1074_v37 = vsel %vm465_vm1, %v1066_v34, 0.0 }
 0x4af   : > { %v1034_v33 = vpop.permute.xlu0 %1033  ;;  %v1075_v41 = vrot.slane %v1074_v37, 4 }
 0x4b0   : > { %v1067_v14 = vmul.f32 %v1034_v33, %v1019_v18 }
 0x4b1   : > { %v1076_v48 = vadd.f32 %v1075_v41, %v1074_v37 }
 0x4b2   : > { %v1081_v35 = vsel %vm465_vm1, %v1067_v14, 0.0 }
 0x4b3   : > { %v1039_v36 = vpop.permute.xlu0 %1038  ;;  %v1082_v12 = vrot.slane %v1081_v35, 4  ;;  %v1077_v59 = vrot.slane %v1076_v48, 2 }
 0x4b4   : > { %v1068_v38 = vmul.f32 %v1039_v36, %v1020_v22 }
 0x4b5   : > { %v1083_v45 = vadd.f32 %v1082_v12, %v1081_v35  ;;  %v1078_v15 = vadd.f32 %v1077_v59, %v1076_v48 }
 0x4b6   : > { %v1088_v40 = vsel %vm465_vm1, %v1068_v38, 0.0 }
 0x4b7   : > { %v1089_v42 = vrot.slane %v1088_v40, 4  ;;  %v1044_v43 = vpop.permute.xlu0 %1043  ;;  %v1084_v6 = vrot.slane %v1083_v45, 2  ;;  %v1079_v56 = vrot.slane %v1078_v15, 1 }
 0x4b8   : > { %v1069_v5 = vmul.f32 %v1044_v43, %v1021_v39 }
 0x4b9   : > { %v1090_v46 = vadd.f32 %v1089_v42, %v1088_v40  ;;  %v1085_v3 = vadd.f32 %v1084_v6, %v1083_v45  ;;  %v1080_v9 = vadd.f32 %v1079_v56, %v1078_v15  ;;  %v1619_v15 = vld [vmem:[%s2437_s6] sm:$0xff]  }
 0x4ba   : > { %v1095_v47 = vsel %vm465_vm1, %v1069_v5, 0.0 }
 0x4bb   : > { %v1096_v49 = vrot.slane %v1095_v47, 4  ;;  %v1049_v50 = vpop.permute.xlu0 %1048  ;;  %v1091_v54 = vrot.slane %v1090_v46, 2  ;;  %v1086_v21 = vrot.slane %v1085_v3, 1  ;;  %v1134_v41 = vpack.c.bf16 %v1080_v9, %v1080_v9 }
 0x4bc   : > { %v1070_v51 = vmul.f32 %v1049_v50, %v1022_v44 }
 0x4bd   : > { %v1097_v53 = vadd.f32 %v1096_v49, %v1095_v47  ;;  %v1092_v10 = vadd.f32 %v1091_v54, %v1090_v46  ;;  %v1087_v63 = vadd.f32 %v1086_v21, %v1085_v3  ;;  %v1154_v50 = vunpack.c.l.b16 %v1134_v41 }
 0x4be   : > { %v1102_v55 = vsel %vm465_vm1, %v1070_v51, 0.0 }
 0x4bf   : > { %v1098_v60 = vrot.slane %v1097_v53, 2  ;;  %v1103_v61 = vrot.slane %v1102_v55, 4  ;;  %v1054_v62 = vpop.permute.xlu0 %1053  ;;  %v1093_v24 = vrot.slane %v1092_v10, 1  ;;  %v1135_v37 = vpack.c.bf16 %v1087_v63, %v1087_v63 }
 0x4c0   : > { %v1071_v1 = vmul.f32 %v1054_v62, %v1023_v52 }
 0x4c1   : > { %v1104_v4 = vadd.f32 %v1103_v61, %v1102_v55  ;;  %v1099_v16 = vadd.f32 %v1098_v60, %v1097_v53  ;;  %v1094_v31 = vadd.f32 %v1093_v24, %v1092_v10  ;;  %v1155_v45 = vunpack.c.l.b16 %v1135_v37 }
 0x4c2   : > { %v1109_v11 = vsel %vm465_vm1, %v1071_v1, 0.0 }
 0x4c3   : > { %v1105_v8 = vrot.slane %v1104_v4, 2  ;;  %v1059_v17 = vpop.permute.xlu0 %1058  ;;  %v1110_v19 = vrot.slane %v1109_v11, 4  ;;  %v1100_v27 = vrot.slane %v1099_v16, 1  ;;  %v1136_v12 = vpack.c.bf16 %v1094_v31, %v1094_v31 }
 0x4c4   : > { %v1072_v20 = vmul.f32 %v1059_v17, %v1024_v2  ;;  %v1162_v54 = vsel %vm809_vm2, %v1155_v45, %v1154_v50 }
 0x4c5   : > { %v1106_v23 = vadd.f32 %v1105_v8, %v1104_v4  ;;  %v1111_v26 = vadd.f32 %v1110_v19, %v1109_v11  ;;  %v1101_v34 = vadd.f32 %v1100_v27, %v1099_v16  ;;  %v1156_v49 = vunpack.c.l.b16 %v1136_v12  ;;  %v1620_v8 = vld [vmem:[%s2437_s6 + $0x8] sm:$0xff]  }
 0x4c6   : > { %v1116_v25 = vsel %vm465_vm1, %v1072_v20, 0.0 }
 0x4c7   : > { %v1117_v57 = vrot.slane %v1116_v25, 4  ;;  %v1064_v28 = vpop.permute.xlu0 %1063  ;;  %v1107_v58 = vrot.slane %v1106_v23, 1  ;;  %v1112_v29 = vrot.slane %v1111_v26, 2  ;;  %v1137_v42 = vpack.c.bf16 %v1101_v34, %v1101_v34 }
 0x4c8   : > { %v1073_v30 = vmul.f32 %v1064_v28, %v1025_v32  ;;  %v1163_v60 = vsel %vm811_vm3, %v1156_v49, %v1162_v54 }
 0x4c9   : > { %v1118_v13 = vadd.f32 %v1117_v57, %v1116_v25  ;;  %v1113_v18 = vadd.f32 %v1112_v29, %v1111_v26  ;;  %v1108_v35 = vadd.f32 %v1107_v58, %v1106_v23  ;;  %v1157_v51 = vunpack.c.l.b16 %v1137_v42  ;;  %v1462_v23 = vld [vmem:[%s2439_s8] ss:$0 sm:$0xff] }
 0x4ca   : > { %v1123_v33 = vsel %vm465_vm1, %v1073_v30, 0.0 }
 0x4cb   : > { %v1119_v14 = vrot.slane %v1118_v13, 2  ;;  %v1124_v22 = vrot.slane %v1123_v33, 4  ;;  %v1114_v36 = vrot.slane %v1113_v18, 1  ;;  %v1138_v44 = vpack.c.bf16 %v1108_v35, %v1108_v35 }
 0x4cc   : > { %v1164_v62 = vsel %vm813_vm4, %v1157_v51, %v1163_v60 }
 0x4cd   : > { %v1120_v38 = vadd.f32 %v1119_v14, %v1118_v13  ;;  %v1125_v39 = vadd.f32 %v1124_v22, %v1123_v33  ;;  %v1115_v40 = vadd.f32 %v1114_v36, %v1113_v18  ;;  %v1158_v53 = vunpack.c.l.b16 %v1138_v44 }
 0x4cf   : > { %v1121_v43 = vrot.slane %v1120_v38, 1  ;;  %v1126_v5 = vrot.slane %v1125_v39, 2  ;;  %v1139_v46 = vpack.c.bf16 %v1115_v40, %v1115_v40  ;;  %v1165_v2 = vsel %vm815_vm5, %v1158_v53, %v1164_v62 }
 0x4d1   : > { %v1122_v47 = vadd.f32 %v1121_v43, %v1120_v38  ;;  %v1127_v48 = vadd.f32 %v1126_v5, %v1125_v39  ;;  %v1159_v55 = vunpack.c.l.b16 %v1139_v46 }
 0x4d3   : > { %v1140_v52 = vpack.c.bf16 %v1122_v47, %v1122_v47  ;;  %v1128_v6 = vrot.slane %v1127_v48, 1  ;;  %v1166_v3 = vsel %vm817_vm6, %v1159_v55, %v1165_v2 }
 0x4d5   : > { %v1129_v59 = vadd.f32 %v1128_v6, %v1127_v48  ;;  %v1160_v61 = vunpack.c.l.b16 %v1140_v52 }
 0x4d7   : > { %v1141_v1 = vpack.c.bf16 %v1129_v59, %v1129_v59  ;;  %v1167_v10 = vsel %vm819_vm7, %v1160_v61, %v1166_v3 }
 0x4d9   : > { %v1161_v4 = vunpack.c.l.b16 %v1141_v1 }
 0x4db   : > { %v1168_v11 = vsel %vm821_vm8, %v1161_v4, %v1167_v10 }
 0x4dc   : > { %v1169_v16 = vpack.c.b16 %v1168_v11, %v1168_v11 }
 0x4de   : > { %1508 = vmatmul.mubr.msk.bf16.vlgmr.msra.gmra.mrb[4].mxu0 %vm465_vm1, %v1169_v16 }
 0x4df   : > { %1512 = vmatpush3.bf16.msra.mxu0 %v1619_v15  ;;  %1515 = vmatprep.mubr.msk.bf16.mxu0 %vm1891_vm0, %v1890_v0 }
 0x4e0   : > { %1513 = vmatprep.subr.bf16.mxu0 %v1890_v0 }
 0x4e3   : > { %1514 = vmatpush3.bf16.msra.mxu0 %v1620_v8 }
 0x4e6   : > { %1516 = vmatmul.mubr.msk.bf16.vlgmr.msra.gmra.mrb[8].mxu0 %vm465_vm1, %v2218_v7 }
 0x5b1   : > { %v1219_v17 = vpop.f32.mrb[4].mxu0 }
 0x5b2   : > { %v1509_v19 = vpop.f32.mrb[5].mxu0 }
 0x5b3   : > { %v1222_v20 = vpop.f32.mrb[6].mxu0 }
 0x5b4   : > { %v1510_v32 = vpop.f32.mrb[7].mxu0 }
 0x5b9   : > { %v1271_v21 = vpop.f32.mrb[8].mxu0 }
 0x5ba   : > { %v1272_v24 = vadd.f32 %v1271_v21, %v1219_v17  ;;  %v1517_v26 = vpop.f32.mrb[9].mxu0 }
 0x5bb   : > { %v1274_v25 = vpop.f32.mrb[10].mxu0 }
 0x5bc   : > { %v1284_v56 = vadd.f32 %v1462_v23, %v1272_v24  ;;  %v1518_v0 = vpop.f32.mrb[11].mxu0 }
 0x5be   : > { %v1285_v7 = vmax.f32 %v1284_v56, 0.0 }
 0x5c0   : > { %v1286_v27 = vpack.c.bf16 %v1285_v7, %v1285_v7 }
 0x5c2   : > { %1287 = vst [vmem:[%s430_s20] sm:$0xf] %v1286_v27 }
 0x5c3   : > { %1816 = shalt.err (!%p1813_p10)
}
 0x5c4   : > { %s1817_s7 = scalar_lea.hbm %s2387_s9, 64  ;;  %s1821_s22 = scalar_lea.hbm %s2476_s17, 128 }
 0x5c5   : > { %p1818_p13 = scmp.ne.s32.totalorder %s2387_s9, %s1817_s7  ;;  %p1822_p9 = scmp.lt.u32.totalorder %s2387_s9, %s2476_s17 }
 0x5c6   : > { %p1823_p3 = scmp.lt.u32.totalorder %s1821_s22, %s1817_s7  ;;  %p1825_p12 = scmp.lt.u32.totalorder %s1817_s7, %s2387_s9 }
 0x5c7   : > { %p1819_p5 = pnand %p1818_p13, %p2477_p1 }
 0x5c8   : > { %p1824_p7 = por %p1823_p3, %p1822_p9 }
 0x5c9   : > { %p1820_p11 = pneg %p1819_p5 }
 0x5ca   : > { %p1826_p2 = por %p1825_p12, %p1824_p7 }
 0x5cc   : > { %p1827_p4 = pnand %p1826_p2, %p1820_p11 }
 0x5ce   : > { %1830 = shalt.err (!%p1827_p4)
}
 0x5cf   : > { %1535 = dma.vmem_to_hbm [thread:$0]  (%p2477_p1), %s2389_s24, 64, %s2387_s9, %s1289_s15  }
 0x5d0 PF: > { %s2478_s25 = sld [smem:[#allocation17_spill]]  ;;  %s2479_s18 = sld [smem:[#allocation18_spill]] }
 0x5d1   : > { %p2481_p8 = scmp.ge.s32.totalorder %s1881_s12, 2 }
 0x5d6   : > { %s1314_s19 = sand.u32 1, %s2478_s25   ;;  %p2480_p0 = scmp.ne.s32.totalorder %s2479_s18, 0 }
 0x5d7   : > { %s1315_s20 = scalar_lea.sflag [#allocation4], %s1314_s19 }
 0x5d8   : > { %p1555_p6 = pnand %p2481_p8, %p2480_p0 }
 0x5da   : > { %1864 = dma.done.wait (!%p1555_p6), %s1315_s20, 64  }
 0x5db   : > { %1866 = vsyncadd (!%p1555_p6), %s1315_s20, 4294967232  ;;  %p26_p10 = scmp.ge.s32.totalorder %s2085_s14, 4   ;;  %s2482_s30 = smov %s1873_s10 }
 0x5dc   : > { %s2483_s10 = smov %s1877_s11  ;;  %s2484_s11 = smov %s2095_s16 }
 0x5dd   : > { %s2485_s12 = smov %s2085_s14  ;;  %28 = sbr.rel (!%p26_p10) target bundleno = 14 (0xe), region = 126 }
 0x5e4   :  { %1320 = vsyncpa [#allocation3], 1 }
 0x5e5   :  { %1322 = vsyncpa [#allocation3 + $0x1], 1 }
 0x5e6   :  { %1323 = vsyncpa [#allocation6], 1 }
 0x5e7   :  { %1325 = vsyncpa [#allocation6 + $0x1], 1 }
 0x5e8   :  { %1326 = vsyncpa [#allocation9], 1 }
 0x5e9   :  { %1327 = vsyncpa [#allocation4], 1 }
 0x5ea   :  { %1329 = vsyncpa [#allocation4 + $0x1], 1 }

</bundles_post_ra>
